<compile_context>
chip_gen: v6e
topology: v6e:2x2x1
jax: 0.10.0
libtpu: 0.0.40
codegen_flags: <defaults>
</compile_context>

<pallas_src>
import functools
import math

import jax
import jax.numpy as jnp
from jax import lax
from jax.experimental import pallas as pl
from jax.experimental.pallas import tpu as pltpu


def _nw_kernel(xts_ref, xtr_ref, ytr_ref, sqt_ref, sqr_ref, o_ref,
               acc_ref, *, reg, p_out):
    j = pl.program_id(1)

    @pl.when(j == 0)
    def _():
        acc_ref[...] = jnp.zeros_like(acc_ref)

    # cross = (Xtest / ls^2) @ Xtrain^T   -> already scaled by 2 * inv_two_ls2
    cross = lax.dot_general(
        xts_ref[...], xtr_ref[...],
        dimension_numbers=(((1,), (1,)), ((), ())),
        preferred_element_type=jnp.float32)                    # (tm, tn) on MXU

    # exponent = -||xt - xr||^2 / (2 ls^2), clamped to <= 0 (matches d2 >= 0)
    expo = jnp.minimum(cross - sqt_ref[...] - sqr_ref[...], 0.0)
    k_blk = jnp.exp(expo)                                      # Gaussian RBF block
    if reg != 0.0:                                             # specialize at trace time
        k_blk = k_blk + reg

    # Fused numer/denom: Ytrain was augmented with a ones column, so the last
    # accumulator column is exactly K.sum(axis=1).
    acc_ref[...] += jnp.dot(k_blk.astype(jnp.bfloat16), ytr_ref[...],
                            preferred_element_type=jnp.float32)  # (tm, P+1)

    @pl.when(j == pl.num_programs(1) - 1)
    def _():
        acc = acc_ref[...]
        numer = acc[:, :p_out]
        denom = acc[:, p_out:p_out + 1]
        o_ref[...] = (numer / (denom + 1e-8)).astype(o_ref.dtype)


def nw_forward(Ytrain, Xtrain, Xtest, *, log_lengthscale=0.0, reg=0.0,
               tm=128, tn=256):
    """Pallas implementation of NWFunctional.forward (Gaussian RBF kernel).

    log_lengthscale / reg are Python floats (deterministic init 0.0 as in the
    nn.Parameter).  # TODO(synk): support traced log_lengthscale via an SMEM
    scalar input if it must flow through jit/grad as a learnable parameter.
    """
    M, D = Xtest.shape
    N, Dx = Xtrain.shape
    Ny, P = Ytrain.shape
    assert D == Dx and N == Ny

    tm = min(tm, M)
    tn = min(tn, N)
    assert M % tm == 0 and N % tn == 0, "M, N must be divisible by tile sizes"

    lengthscale = math.exp(float(log_lengthscale))
    inv_two_ls2 = 1.0 / (2.0 * lengthscale * lengthscale)
    inv_ls2 = 2.0 * inv_two_ls2

    Xtest = Xtest.astype(jnp.float32)
    Xtrain = Xtrain.astype(jnp.float32)

    # Hoisted, amortized precompute (once per call, not per grid step).
    xts = Xtest * inv_ls2                                                   # (M, D)
    sqt = jnp.sum(Xtest * Xtest, axis=1, keepdims=True) * inv_two_ls2       # (M, 1)
    sqr = (jnp.sum(Xtrain * Xtrain, axis=1) * inv_two_ls2)[None, :]         # (1, N)
    y_aug = jnp.concatenate(
        [Ytrain.astype(jnp.float32), jnp.ones((N, 1), jnp.float32)], axis=1
    ).astype(jnp.bfloat16)                                                  # (N, P+1)

    kernel = functools.partial(_nw_kernel, reg=float(reg), p_out=P)

    grid = (M // tm, N // tn)
    return pl.pallas_call(
        kernel,
        out_shape=jax.ShapeDtypeStruct((M, P), jnp.float32),
        grid_spec=pltpu.PrefetchScalarGridSpec(
            num_scalar_prefetch=0,
            grid=grid,
            in_specs=[
                pl.BlockSpec((tm, D), lambda i, j: (i, 0)),        # scaled Xtest tile
                pl.BlockSpec((tn, D), lambda i, j: (j, 0)),        # Xtrain tile
                pl.BlockSpec((tn, P + 1), lambda i, j: (j, 0)),    # [Ytrain | 1] tile (bf16)
                pl.BlockSpec((tm, 1), lambda i, j: (i, 0)),        # scaled ||Xtest||^2
                pl.BlockSpec((1, tn), lambda i, j: (0, j)),        # scaled ||Xtrain||^2
            ],
            out_specs=pl.BlockSpec((tm, P), lambda i, j: (i, 0)),
            scratch_shapes=[
                pltpu.VMEM((tm, P + 1), jnp.float32),   # fused numer/denom accumulator
            ],
        ),
        compiler_params=pltpu.CompilerParams(
            dimension_semantics=("parallel", "arbitrary")),
    )(xts, Xtrain, y_aug, sqt, sqr)


def nw_forward_ref(Ytrain, Xtrain, Xtest, *, log_lengthscale=0.0, reg=0.0):
    """Pure-JAX f32 reference matching the PyTorch module semantics."""
    ls = math.exp(float(log_lengthscale))
    d2 = (jnp.sum(Xtest ** 2, axis=1, keepdims=True)
          + jnp.sum(Xtrain ** 2, axis=1)[None, :]
          - 2.0 * Xtest @ Xtrain.T)
    K = jnp.exp(-jnp.maximum(d2, 0.0) / (2.0 * ls * ls)) + reg
    numer = K @ Ytrain
    denom = jnp.sum(K, axis=1, keepdims=True) + 1e-8
    return numer / denom


if __name__ == "__main__":
    key = jax.random.PRNGKey(0)
    k1, k2, k3 = jax.random.split(key, 3)

    # Small but tile-aligned shapes: M//tm = 2 (keeps both v7x cores busy),
    # N//tn = 2 (exercises the sequential reduction axis).
    M, N, D, P = 256, 512, 16, 8
    Xtest = jax.random.normal(k1, (M, D), dtype=jnp.float32)
    Xtrain = jax.random.normal(k2, (N, D), dtype=jnp.float32)
    Ytrain = jax.random.normal(k3, (N, P), dtype=jnp.float32)

    # Deterministic parameter init: log_lengthscale = 0.0, reg = 0.0 (defaults).
    out = nw_forward(Ytrain, Xtrain, Xtest, log_lengthscale=0.0, reg=0.0)
    out = jax.block_until_ready(out)

    ref = nw_forward_ref(Ytrain, Xtrain, Xtest, log_lengthscale=0.0, reg=0.0)
    assert out.shape == (M, P)
    # Tolerance accounts for the bf16 K@Y matmul (K in [0,1], accumulate f32).
    assert jnp.allclose(out, ref, atol=2e-2, rtol=2e-2), "mismatch vs reference"

    print("KERNEL_OK")
</pallas_src>

<mosaic_0001>
module attributes {stable_mosaic.version = 11 : i64} {
  func.func @_nw_kernel(%arg0: i32, %arg1: i32, %arg2: memref<128x16xf32, #tpu.memory_space<vmem>>, %arg3: memref<256x16xf32, #tpu.memory_space<vmem>>, %arg4: memref<256x9xbf16, #tpu.memory_space<vmem>>, %arg5: memref<128x1xf32, #tpu.memory_space<vmem>>, %arg6: memref<1x256xf32, #tpu.memory_space<vmem>>, %arg7: memref<128x8xf32, #tpu.memory_space<vmem>>, %arg8: memref<128x9xf32, #tpu.memory_space<vmem>>) attributes {dimension_semantics = [#tpu.dimension_semantics<parallel>, #tpu.dimension_semantics<arbitrary>], iteration_bounds = array<i64: 2, 2>, scalar_prefetch = 0 : i64, scratch_operands = 1 : i64, tpu.core_type = #tpu.core_type<tc>, window_params = [{transform_indices = @transform_0, window_bounds = array<i64: 128, 16>}, {transform_indices = @transform_1, window_bounds = array<i64: 256, 16>}, {transform_indices = @transform_2, window_bounds = array<i64: 256, 9>}, {transform_indices = @transform_3, window_bounds = array<i64: 128, 1>}, {transform_indices = @transform_4, window_bounds = array<i64: 1, 256>}, {transform_indices = @transform_5, window_bounds = array<i64: 128, 8>}]} {
    %c0_i32 = arith.constant 0 : i32
    %0 = arith.cmpi eq, %arg1, %c0_i32 : i32
    %1 = arith.extui %0 : i1 to i32
    %c0_i32_0 = arith.constant 0 : i32
    %2 = arith.cmpi ne, %1, %c0_i32_0 : i32
    scf.if %2 {
      %cst_17 = arith.constant 0.000000e+00 : f32
      %24 = vector.broadcast %cst_17 : f32 to vector<128x9xf32>
      %c0_18 = arith.constant 0 : index
      %c0_19 = arith.constant 0 : index
      %25 = vector.load %arg8[%c0_18, %c0_19] : memref<128x9xf32, #tpu.memory_space<vmem>>, vector<128x9xf32>
      tpu.vector_store %arg8[%c0_18, %c0_19], %24 {strides = array<i32>} : memref<128x9xf32, #tpu.memory_space<vmem>>, vector<128x9xf32>,
    } else {
    }
    %c0 = arith.constant 0 : index
    %c0_1 = arith.constant 0 : index
    %3 = vector.load %arg2[%c0, %c0_1] : memref<128x16xf32, #tpu.memory_space<vmem>>, vector<128x16xf32>
    %c0_2 = arith.constant 0 : index
    %c0_3 = arith.constant 0 : index
    %4 = vector.load %arg3[%c0_2, %c0_3] : memref<256x16xf32, #tpu.memory_space<vmem>>, vector<256x16xf32>
    %cst = arith.constant dense<0.000000e+00> : vector<128x256xf32>
    %5 = tpu.matmul %3, %4, %cst {dimension_numbers = #tpu.dot_dimension_numbers<[1], [1], [0], [0], [0, 0, 1, 0], [], []>} : vector<128x16xf32>, vector<256x16xf32>, vector<128x256xf32> -> vector<128x256xf32>
    %c0_4 = arith.constant 0 : index
    %c0_5 = arith.constant 0 : index
    %6 = vector.load %arg5[%c0_4, %c0_5] : memref<128x1xf32, #tpu.memory_space<vmem>>, vector<128x1xf32>
    %7 = vector.broadcast %6 : vector<128x1xf32> to vector<128x256xf32>
    %8 = arith.subf %5, %7 : vector<128x256xf32>
    %c0_6 = arith.constant 0 : index
    %c0_7 = arith.constant 0 : index
    %9 = vector.load %arg6[%c0_6, %c0_7] : memref<1x256xf32, #tpu.memory_space<vmem>>, vector<1x256xf32>
    %10 = vector.broadcast %9 : vector<1x256xf32> to vector<128x256xf32>
    %11 = arith.subf %8, %10 : vector<128x256xf32>
    %cst_8 = arith.constant 0.000000e+00 : f32
    %12 = vector.broadcast %cst_8 : f32 to vector<128x256xf32>
    %13 = arith.minimumf %11, %12 : vector<128x256xf32>
    %14 = math.exp %13 : vector<128x256xf32>
    %c0_9 = arith.constant 0 : index
    %c0_10 = arith.constant 0 : index
    %15 = vector.load %arg8[%c0_9, %c0_10] : memref<128x9xf32, #tpu.memory_space<vmem>>, vector<128x9xf32>
    %16 = arith.truncf %14 : vector<128x256xf32> to vector<128x256xbf16>
    %c0_11 = arith.constant 0 : index
    %c0_12 = arith.constant 0 : index
    %17 = vector.load %arg4[%c0_11, %c0_12] : memref<256x9xbf16, #tpu.memory_space<vmem>>, vector<256x9xbf16>
    %cst_13 = arith.constant dense<0.000000e+00> : vector<128x9xf32>
    %18 = tpu.matmul %16, %17, %cst_13 {dimension_numbers = #tpu.dot_dimension_numbers<[1], [0], [0], [1], [0, 0, 1, 1], [], []>} : vector<128x256xbf16>, vector<256x9xbf16>, vector<128x9xf32> -> vector<128x9xf32>
    %19 = arith.addf %15, %18 : vector<128x9xf32>
    %c0_14 = arith.constant 0 : index
    %c0_15 = arith.constant 0 : index
    %20 = vector.load %arg8[%c0_14, %c0_15] : memref<128x9xf32, #tpu.memory_space<vmem>>, vector<128x9xf32>
    tpu.vector_store %arg8[%c0_14, %c0_15], %19 {strides = array<i32>} : memref<128x9xf32, #tpu.memory_space<vmem>>, vector<128x9xf32>,
    %c1_i32 = arith.constant 1 : i32
    %21 = arith.cmpi eq, %arg1, %c1_i32 : i32
    %22 = arith.extui %21 : i1 to i32
    %c0_i32_16 = arith.constant 0 : i32
    %23 = arith.cmpi ne, %22, %c0_i32_16 : i32
    scf.if %23 {
      %c0_17 = arith.constant 0 : index
      %c0_18 = arith.constant 0 : index
      %24 = vector.load %arg8[%c0_17, %c0_18] : memref<128x9xf32, #tpu.memory_space<vmem>>, vector<128x9xf32>
      %25 = vector.extract_strided_slice %24 {offsets = [0, 0], sizes = [128, 8], strides = [1, 1]} : vector<128x9xf32> to vector<128x8xf32>
      %26 = vector.extract_strided_slice %24 {offsets = [0, 8], sizes = [128, 1], strides = [1, 1]} : vector<128x9xf32> to vector<128x1xf32>
      %cst_19 = arith.constant 9.99999993E-9 : f32
      %27 = vector.broadcast %cst_19 : f32 to vector<128x1xf32>
      %28 = arith.addf %26, %27 : vector<128x1xf32>
      %29 = vector.broadcast %28 : vector<128x1xf32> to vector<128x8xf32>
      %30 = arith.divf %25, %29 : vector<128x8xf32>
      %c0_20 = arith.constant 0 : index
      %c0_21 = arith.constant 0 : index
      %31 = vector.load %arg7[%c0_20, %c0_21] : memref<128x8xf32, #tpu.memory_space<vmem>>, vector<128x8xf32>
      tpu.vector_store %arg7[%c0_20, %c0_21], %30 {strides = array<i32>} : memref<128x8xf32, #tpu.memory_space<vmem>>, vector<128x8xf32>,
    } else {
    }
    return
  }
  func.func @transform_0(%arg0: i32, %arg1: i32) -> (i32, i32) {
    %c0_i32 = arith.constant 0 : i32
    %c0_i32_0 = arith.constant 0 : i32
    return %arg0, %c0_i32 : i32, i32
  }
  func.func @transform_1(%arg0: i32, %arg1: i32) -> (i32, i32) {
    %c0_i32 = arith.constant 0 : i32
    %c0_i32_0 = arith.constant 0 : i32
    return %arg1, %c0_i32 : i32, i32
  }
  func.func @transform_2(%arg0: i32, %arg1: i32) -> (i32, i32) {
    %c0_i32 = arith.constant 0 : i32
    %c0_i32_0 = arith.constant 0 : i32
    return %arg1, %c0_i32 : i32, i32
  }
  func.func @transform_3(%arg0: i32, %arg1: i32) -> (i32, i32) {
    %c0_i32 = arith.constant 0 : i32
    %c0_i32_0 = arith.constant 0 : i32
    return %arg0, %c0_i32 : i32, i32
  }
  func.func @transform_4(%arg0: i32, %arg1: i32) -> (i32, i32) {
    %c0_i32 = arith.constant 0 : i32
    %c0_i32_0 = arith.constant 0 : i32
    return %c0_i32, %arg1 : i32, i32
  }
  func.func @transform_5(%arg0: i32, %arg1: i32) -> (i32, i32) {
    %c0_i32 = arith.constant 0 : i32
    %c0_i32_0 = arith.constant 0 : i32
    return %arg0, %c0_i32 : i32, i32
  }
}

</mosaic_0001>

<bundles_post_ra>
// kernel: tpu_custom_call.1
= control target key start
LH: loop header
LB: loop body
LE: loop exit
PB: predicated region body
PF: predicated region fallthrough
CT: control target
= control target key end

     0   :  { %s1981_s18 = smov 0   ;;  %s1983_s19 = smov 0   ;;  %s2380_s0 = inlined_call_operand.vmem [shape: f32[256,16], index: 0, kind: input, shape index: {}]   ;;  %s2381_s1 = inlined_call_operand.vmem [shape: f32[512,16], index: 1, kind: input, shape index: {}]   ;;  %s2382_s2 = inlined_call_operand.vmem [shape: bf16[512,9], index: 2, kind: input, shape index: {}]   ;;  %s2383_s3 = inlined_call_operand.vmem [shape: f32[256,1], index: 3, kind: input, shape index: {}]   ;;  %s2384_s4 = inlined_call_operand.vmem [shape: f32[1,512], index: 4, kind: input, shape index: {}]   ;;  %s2385_s5 = inlined_call_operand.vmem [shape: f32[256,8], index: 5, kind: output, shape index: {}]  }
   0x1   :  { %s1985_s20 = smov 0   ;;  %s1987_s21 = smov 0  }
   0x2   :  { %s1989_s22 = smov 0  }
   0x3 LB: > { %s24_s23 = sadd.s32 1, %s1938_s20  ;;  %s27_s24 = sadd.s32 1, %s1942_s21  ;;  %s1946_s22 = sphi %s1989_s22, %s15_s22   ;;  %s1942_s21 = sphi %s1987_s21, %s2389_s21   ;;  %s1938_s20 = sphi %s1985_s20, %s2388_s20   ;;  %s1934_s19 = sphi %s1983_s19, %s2387_s19   ;;  %s1930_s18 = sphi %s1981_s18, %s2386_s18  }
   0x4   : > { %p25_p0 = scmp.ge.s32.totalorder %s24_s23, 2  ;;  %p1541_p1 = scmp.ge.s32.totalorder %s1946_s22, 1 }
   0x5   : > { %p243_p2 = scmp.lt.s32.totalorder %s1946_s22, 5 }
   0x6   : > { %s2391_s23 = smov (%p25_p0, %s24_s23), 0  ;;  %s2393_s24 = smov (!%p25_p0, %s27_s24), %s1942_s21 }
   0x7   : > { %p244_p3 = pnand %p1541_p1, %p243_p2  ;;  %p29_p4 = scmp.ge.s32.totalorder %s2393_s24, 2 }
   0x8   : > { %s1542_s25 = sshll.u32 (!%p244_p3), %s1934_s19, 4  ;;  %s1544_s26 = sshll.u32 (!%p244_p3), %s1930_s18, 5 }
   0x9   : > { %s2395_s24 = smov (%p29_p4, %s2393_s24), 0  ;;  %247 = sbr.rel (%p244_p3) target bundleno = 757 (0x2f5), region = 40 }
   0xa   : > { %p291_p5 = scmp.lt.s32.totalorder (!%p244_p3), %s1542_s25, 31  ;;  %p297_p6 = scmp.lt.s32.totalorder (!%p244_p3), %s1544_s26, 63 }
   0xb   : > { %s1550_s27 = sshll.u32 (!%p244_p3), %s1930_s18, 1  ;;  %p1553_p8 = scmp.ne.s32.totalorder (!%p244_p3), %s1930_s18, 0 }
   0xc   : > { %p315_p7 = scmp.lt.s32.totalorder (!%p244_p3), %s1550_s27, 3 }
   0xe   : > { %s2397_s25 = smov (!%p291_p5, %s1542_s25), 31  ;;  %s2399_s26 = smov (!%p297_p6, %s1544_s26), 63 }
   0xf   : > { %s1543_s28 = sshll.u32 %s2397_s25, 3  ;;  %s1545_s7 = sshll.u32 %s2399_s26, 3 }
  0x10   : > { %s2018_s6 = scalar_lea.vmem %s2380_s0, %s1543_s28  ;;  %s2023_s10 = scalar_lea.vmem %s2381_s1, %s1545_s7 }
  0x11   : > { %s1547_s11 = sshll.u32 %s2399_s26, 2  ;;  %s2033_s17 = scalar_lea.vmem %s2383_s3, %s1543_s28 }
  0x12   : > { %s2028_s14 = scalar_lea.vmem %s2382_s2, %s1547_s11  ;;  %s2401_s27 = smov (!%p315_p7, %s1550_s27), 3 }
  0x13   : > { %s2040_s29 = scalar_lea.vmem %s2385_s5, %s1543_s28  ;;  %s317_s7 = scalar_lea.vmem %s2384_s4, %s2401_s27 }
  0x14   : > { %329 = sbr.rel (%p1553_p8) target bundleno = 34 (0x22), region = 44 }
  0x19   : > { %vm330_vm0 = vcmask 72704   ;;  %v1948_v0 = vmov 0.0  }
  0x1a   : > { %331 = vst.msk [vmem:[#allocation2] sm:$0xff] %vm330_vm0, %v1948_v0  ;;  %332 = vst.msk [vmem:[#allocation2 + $0x8] sm:$0xff] %vm330_vm0, %v1948_v0 }
  0x1b   : > { %333 = vst.msk [vmem:[#allocation2 + $0x10] sm:$0xff] %vm330_vm0, %v1948_v0  ;;  %334 = vst.msk [vmem:[#allocation2 + $0x18] sm:$0xff] %vm330_vm0, %v1948_v0 }
  0x1c   : > { %335 = vst.msk [vmem:[#allocation2 + $0x20] sm:$0xff] %vm330_vm0, %v1948_v0  ;;  %336 = vst.msk [vmem:[#allocation2 + $0x28] sm:$0xff] %vm330_vm0, %v1948_v0 }
  0x1d   : > { %337 = vst.msk [vmem:[#allocation2 + $0x30] sm:$0xff] %vm330_vm0, %v1948_v0  ;;  %338 = vst.msk [vmem:[#allocation2 + $0x38] sm:$0xff] %vm330_vm0, %v1948_v0 }
  0x1e   : > { %339 = vst.msk [vmem:[#allocation2 + $0x40] sm:$0xff] %vm330_vm0, %v1948_v0  ;;  %340 = vst.msk [vmem:[#allocation2 + $0x48] sm:$0xff] %vm330_vm0, %v1948_v0 }
  0x1f   : > { %341 = vst.msk [vmem:[#allocation2 + $0x50] sm:$0xff] %vm330_vm0, %v1948_v0  ;;  %342 = vst.msk [vmem:[#allocation2 + $0x58] sm:$0xff] %vm330_vm0, %v1948_v0 }
  0x20   : > { %343 = vst.msk [vmem:[#allocation2 + $0x60] sm:$0xff] %vm330_vm0, %v1948_v0  ;;  %344 = vst.msk [vmem:[#allocation2 + $0x68] sm:$0xff] %vm330_vm0, %v1948_v0 }
  0x21   : > { %345 = vst.msk [vmem:[#allocation2 + $0x70] sm:$0xff] %vm330_vm0, %v1948_v0  ;;  %346 = vst.msk [vmem:[#allocation2 + $0x78] sm:$0xff] %vm330_vm0, %v1948_v0 }
  0x22 PF: > { %v394_v1 = vld [vmem:[%s2023_s10 + $0xf8] sm:$0xff]  ;;  %vm395_vm1 = vcmask 130048   ;;  %v393_v3 = vld [vmem:[%s2023_s10 + $0xf0] sm:$0xff]  ;;  %v1949_v4 = vmov 0   ;;  %v392_v6 = vld [vmem:[%s2023_s10 + $0xe8] sm:$0xff]  ;;  %vm1242_vm2 = vcmask 72704  }
  0x23   : > { %v378_v2 = vld [vmem:[%s2023_s10 + $0x78] sm:$0xff]  ;;  %1621 = vmatprep.subr.msk.mxu0 %vm395_vm1, %v394_v1  ;;  %1792 = vset.pattern.permute.xlu0 %v1949_v4  ;;  %v377_v5 = vld [vmem:[%s2023_s10 + $0x70] sm:$0xff]  ;;  %v376_v7 = vld [vmem:[%s2023_s10 + $0x68] sm:$0xff]  ;;  %p1618_p9 = scmp.ne.s32.totalorder %s1930_s18, 1 }
  0x24   : > { %1622 = vmatpush3.xpose.msk.msra.mxu0 %vm395_vm1, %v378_v2  ;;  %1793 = vset.pattern.permute.xlu1 %v1949_v4  ;;  %v391_v8 = vld [vmem:[%s2023_s10 + $0xe0] sm:$0xff]  ;;  %v390_v11 = vld [vmem:[%s2023_s10 + $0xd8] sm:$0xff]  ;;  %v703_v14 = vld [vmem:[%s2033_s17 + $0x10] sm:$0xff] }
  0x25   : > { %1623 = vmatprep.subr.msk.mxu0 %vm395_vm1, %v393_v3  ;;  %v2077_v9 = vld [vmem:[%s2018_s6] sm:$0xff]  ;;  %v374_v13 = vld [vmem:[%s2023_s10 + $0x58] sm:$0xff]  ;;  %v389_v15 = vld [vmem:[%s2023_s10 + $0xd0] sm:$0xff]  ;;  %729 = vperm.xlu1 %1793, %v703_v14  }
  0x26   : > { %v375_v10 = vld [vmem:[%s2023_s10 + $0x60] sm:$0xff]  ;;  %1653 = vmatprep.mubr.msk.f32.mxu0 %vm395_vm1, %v2077_v9  ;;  %v702_v16 = vld [vmem:[%s2033_s17 + $0x8] sm:$0xff]  ;;  %v704_v17 = vld [vmem:[%s2033_s17 + $0x18] sm:$0xff] }
  0x27   : > { %v701_v12 = vld [vmem:[%s2033_s17] sm:$0xff]  ;;  %v373_v18 = vld [vmem:[%s2023_s10 + $0x50] sm:$0xff]  ;;  %v388_v19 = vld [vmem:[%s2023_s10 + $0xc8] sm:$0xff] }
  0x28   : > { %1624 = vmatpush3.xpose.msk.msra.mxu0 %vm395_vm1, %v377_v5  ;;  %719 = vperm.xlu0 %1792, %v701_v12   ;;  %v705_v20 = vld [vmem:[%s2033_s17 + $0x20] sm:$0xff]  ;;  %v372_v21 = vld [vmem:[%s2023_s10 + $0x48] sm:$0xff]  ;;  %v707_v24 = vld [vmem:[%s2033_s17 + $0x30] sm:$0xff] }
  0x29   : > { %1625 = vmatprep.subr.msk.mxu0 %vm395_vm1, %v392_v6  ;;  %734 = vperm.xlu1 %1793, %v704_v17   ;;  %v706_v22 = vld [vmem:[%s2033_s17 + $0x28] sm:$0xff]  ;;  %v387_v23 = vld [vmem:[%s2023_s10 + $0xc0] sm:$0xff]  ;;  %v708_v25 = vld [vmem:[%s2033_s17 + $0x38] sm:$0xff] }
  0x2a   : > { %v371_v26 = vld [vmem:[%s2023_s10 + $0x40] sm:$0xff]  ;;  %v386_v27 = vld [vmem:[%s2023_s10 + $0xb8] sm:$0xff]  ;;  %v710_v29 = vld [vmem:[%s2033_s17 + $0x48] sm:$0xff] }
  0x2b   : > { %v709_v28 = vld [vmem:[%s2033_s17 + $0x40] sm:$0xff]  ;;  %v370_v30 = vld [vmem:[%s2023_s10 + $0x38] sm:$0xff]  ;;  %v385_v31 = vld [vmem:[%s2023_s10 + $0xb0] sm:$0xff] }
  0x2c   : > { %1626 = vmatpush3.xpose.msk.msra.mxu0 %vm395_vm1, %v376_v7  ;;  %724 = vperm.xlu0 %1792, %v702_v16   ;;  %v711_v32 = vld [vmem:[%s2033_s17 + $0x50] sm:$0xff]  ;;  %v712_v33 = vld [vmem:[%s2033_s17 + $0x58] sm:$0xff]  ;;  %v384_v35 = vld [vmem:[%s2023_s10 + $0xa8] sm:$0xff] }
  0x2d   : > { %1627 = vmatprep.subr.msk.mxu0 %vm395_vm1, %v391_v8  ;;  %744 = vperm.xlu1 %1793, %v706_v22   ;;  %v369_v34 = vld [vmem:[%s2023_s10 + $0x30] sm:$0xff]  ;;  %v713_v36 = vld [vmem:[%s2033_s17 + $0x60] sm:$0xff]  ;;  %v714_v37 = vld [vmem:[%s2033_s17 + $0x68] sm:$0xff] }
  0x2e   : > { %v368_v38 = vld [vmem:[%s2023_s10 + $0x28] sm:$0xff]  ;;  %v383_v39 = vld [vmem:[%s2023_s10 + $0xa0] sm:$0xff]  ;;  %v715_v40 = vld [vmem:[%s2033_s17 + $0x70] sm:$0xff] }
  0x2f   : > { %v716_v41 = vld [vmem:[%s2033_s17 + $0x78] sm:$0xff]  ;;  %v367_v42 = vld [vmem:[%s2023_s10 + $0x20] sm:$0xff]  ;;  %v381_v45 = vld [vmem:[%s2023_s10 + $0x90] sm:$0xff] }
  0x30   : > { %1628 = vmatpush3.xpose.msk.msra.mxu0 %vm395_vm1, %v375_v10  ;;  %739 = vperm.xlu0 %1792, %v705_v20   ;;  %v382_v43 = vld [vmem:[%s2023_s10 + $0x98] sm:$0xff]  ;;  %v365_v46 = vld [vmem:[%s2023_s10 + $0x10] sm:$0xff]  ;;  %v380_v47 = vld [vmem:[%s2023_s10 + $0x88] sm:$0xff] }
  0x31   : > { %1629 = vmatprep.subr.msk.mxu0 %vm395_vm1, %v390_v11  ;;  %754 = vperm.xlu1 %1793, %v708_v25   ;;  %v366_v44 = vld [vmem:[%s2023_s10 + $0x18] sm:$0xff]  ;;  %v364_v48 = vld [vmem:[%s2023_s10 + $0x8] sm:$0xff]  ;;  %v379_v49 = vld [vmem:[%s2023_s10 + $0x80] sm:$0xff] }
  0x32   : > { %v363_v50 = vld [vmem:[%s2023_s10] sm:$0xff]  ;;  %v348_v51 = vld [vmem:[%s2018_s6 + $0x8] sm:$0xff]  ;;  %v349_v52 = vld [vmem:[%s2018_s6 + $0x10] sm:$0xff] }
  0x33   : > { %v350_v53 = vld [vmem:[%s2018_s6 + $0x18] sm:$0xff]  ;;  %v351_v54 = vld [vmem:[%s2018_s6 + $0x20] sm:$0xff]  ;;  %v352_v55 = vld [vmem:[%s2018_s6 + $0x28] sm:$0xff] }
  0x34   : > { %1630 = vmatpush3.xpose.msk.msra.mxu0 %vm395_vm1, %v374_v13  ;;  %749 = vperm.xlu0 %1792, %v707_v24   ;;  %v353_v56 = vld [vmem:[%s2018_s6 + $0x30] sm:$0xff]  ;;  %v354_v57 = vld [vmem:[%s2018_s6 + $0x38] sm:$0xff]  ;;  %v355_v58 = vld [vmem:[%s2018_s6 + $0x40] sm:$0xff] }
  0x35   : > { %1631 = vmatprep.subr.msk.mxu0 %vm395_vm1, %v389_v15  ;;  %764 = vperm.xlu1 %1793, %v710_v29   ;;  %v356_v59 = vld [vmem:[%s2018_s6 + $0x48] sm:$0xff]  ;;  %v357_v60 = vld [vmem:[%s2018_s6 + $0x50] sm:$0xff]  ;;  %v358_v61 = vld [vmem:[%s2018_s6 + $0x58] sm:$0xff] }
  0x36   : > { %v359_v62 = vld [vmem:[%s2018_s6 + $0x60] sm:$0xff]  ;;  %v360_v63 = vld [vmem:[%s2018_s6 + $0x68] sm:$0xff]  ;;  %v361_v0 = vld [vmem:[%s2018_s6 + $0x70] sm:$0xff] }
  0x37   : > { %v362_v1 = vld [vmem:[%s2018_s6 + $0x78] sm:$0xff]  ;;  %v1796_v4 = vld [vmem:[%s2028_s14 + $0x70] sm:$0xff]   ;;  %v1798_v6 = vld [vmem:[%s2028_s14 + $0x68] sm:$0xff]  }
  0x38   : > { %1632 = vmatpush3.xpose.msk.msra.mxu0 %vm395_vm1, %v373_v18  ;;  %759 = vperm.xlu0 %1792, %v709_v28   ;;  %v1794_v2 = vld [vmem:[%s2028_s14 + $0x78] sm:$0xff]   ;;  %v1797_v5 = vld [vmem:[%s2028_s14 + $0x30] sm:$0xff]   ;;  %v1799_v7 = vld [vmem:[%s2028_s14 + $0x28] sm:$0xff]   ;;  %v831_v18 = vlaneseq }
  0x39   : > { %1633 = vmatprep.subr.msk.mxu0 %vm395_vm1, %v388_v19  ;;  %774 = vperm.xlu1 %1793, %v712_v33   ;;  %v1795_v3 = vld [vmem:[%s2028_s14 + $0x38] sm:$0xff]   ;;  %v1800_v8 = vld [vmem:[%s2028_s14 + $0x60] sm:$0xff]   ;;  %v1804_v12 = vld [vmem:[%s2028_s14 + $0x50] sm:$0xff]  }
  0x3a   : > { %1685 = vmatprep.subr.bf16.mxu1 %v1794_v2  ;;  %v1802_v10 = vld [vmem:[%s2028_s14 + $0x58] sm:$0xff]   ;;  %v1805_v13 = vld [vmem:[%s2028_s14 + $0x10] sm:$0xff]   ;;  %v1806_v14 = vld [vmem:[%s2028_s14 + $0x48] sm:$0xff]   ;;  %v832_v19 = vshrl.u32 %v831_v18, 7 }
  0x3b   : > { %1686 = vmatpush3.bf16.msra.mxu1 %v1795_v3  ;;  %v1803_v11 = vld [vmem:[%s2028_s14 + $0x18] sm:$0xff]   ;;  %v1807_v15 = vld [vmem:[%s2028_s14 + $0x8] sm:$0xff]   ;;  %v1808_v16 = vld [vmem:[%s2028_s14 + $0x40] sm:$0xff]  }
  0x3c   : > { %1634 = vmatpush3.xpose.msk.msra.mxu0 %vm395_vm1, %v372_v21  ;;  %769 = vperm.xlu0 %1792, %v711_v32   ;;  %v1809_v17 = vld [vmem:[%s2028_s14] sm:$0xff]   ;;  %v833_v20 = vsub.s32 0, %v832_v19  ;;  %v837_v22 = vsub.s32 1, %v832_v19 }
  0x3d   : > { %1635 = vmatprep.subr.msk.mxu0 %vm395_vm1, %v387_v23  ;;  %784 = vperm.xlu1 %1793, %v714_v37   ;;  %v829_v21 = vld [vmem:[%s317_s7] sm:$0x3] }
  0x3e   : > { %1687 = vmatprep.subr.bf16.mxu1 %v1796_v4  ;;  %v2216_v24 = vrot.slane %v829_v21, %v833_v20 }
  0x3f   : > { %1688 = vmatpush3.bf16.msra.mxu1 %v1797_v5 }
  0x40   : > { %1636 = vmatpush3.xpose.msk.msra.mxu0 %vm395_vm1, %v371_v26  ;;  %779 = vperm.xlu0 %1792, %v713_v36  }
  0x41   : > { %1637 = vmatprep.subr.msk.mxu0 %vm395_vm1, %v386_v27  ;;  %794 = vperm.xlu1 %1793, %v716_v41   ;;  %v2218_v27 = vrot.slane %v829_v21, %v837_v22 }
  0x42   : > { %1689 = vmatprep.subr.bf16.mxu1 %v1798_v6 }
  0x43   : > { %1690 = vmatpush3.bf16.msra.mxu1 %v1799_v7 }
  0x44   : > { %1638 = vmatpush3.xpose.msk.msra.mxu0 %vm395_vm1, %v370_v30  ;;  %789 = vperm.xlu0 %1792, %v715_v40  }
  0x45   : > { %1639 = vmatprep.subr.msk.mxu0 %vm395_vm1, %v385_v31  ;;  %1691 = vmatprep.subr.bf16.mxu1 %v1800_v8 }
  0x48   : > { %1640 = vmatpush3.xpose.msk.msra.mxu0 %vm395_vm1, %v369_v34 }
  0x49   : > { %1641 = vmatprep.subr.msk.mxu0 %vm395_vm1, %v384_v35 }
  0x4c   : > { %1642 = vmatpush3.xpose.msk.msra.mxu0 %vm395_vm1, %v368_v38 }
  0x4d   : > { %1643 = vmatprep.subr.msk.mxu0 %vm395_vm1, %v383_v39 }
  0x50   : > { %1644 = vmatpush3.xpose.msk.msra.mxu0 %vm395_vm1, %v367_v42 }
  0x51   : > { %1645 = vmatprep.subr.msk.mxu0 %vm395_vm1, %v382_v43 }
  0x54   : > { %1646 = vmatpush3.xpose.msk.msra.mxu0 %vm395_vm1, %v366_v44 }
  0x55   : > { %1647 = vmatprep.subr.msk.mxu0 %vm395_vm1, %v381_v45 }
  0x58   : > { %1648 = vmatpush3.xpose.msk.msra.mxu0 %vm395_vm1, %v365_v46 }
  0x59   : > { %1649 = vmatprep.subr.msk.mxu0 %vm395_vm1, %v380_v47 }
  0x5c   : > { %1650 = vmatpush3.xpose.msk.msra.mxu0 %vm395_vm1, %v364_v48 }
  0x5d   : > { %1651 = vmatprep.subr.msk.mxu0 %vm395_vm1, %v379_v49 }
  0x60   : > { %1652 = vmatpush3.xpose.msk.msra.mxu0 %vm395_vm1, %v363_v50 }
  0x63   : > { %1654 = vmatmul.mubr.msk.f32.vlgmr.msra.gmra.mxu0 %vm395_vm1, %v2077_v9  ;;  %v1801_v9 = vld [vmem:[%s2028_s14 + $0x20] sm:$0xff]  }
  0x64   : > { %1655 = vmatprep.mubr.msk.f32.mxu0 %vm395_vm1, %v348_v51  ;;  %1692 = vmatpush3.bf16.msra.mxu1 %v1801_v9 }
  0x65   : > { %1693 = vmatprep.subr.bf16.mxu1 %v1802_v10 }
  0x67   : > { %1656 = vmatmul.mubr.msk.f32.gmra.mxu0 %vm395_vm1, %v348_v51 }
  0x68   : > { %1657 = vmatprep.mubr.msk.f32.mxu0 %vm395_vm1, %v349_v52  ;;  %1694 = vmatpush3.bf16.msra.mxu1 %v1803_v11 }
  0x69   : > { %1695 = vmatprep.subr.bf16.mxu1 %v1804_v12 }
  0x6b   : > { %1658 = vmatmul.mubr.msk.f32.gmra.mxu0 %vm395_vm1, %v349_v52 }
  0x6c   : > { %1659 = vmatprep.mubr.msk.f32.mxu0 %vm395_vm1, %v350_v53  ;;  %1696 = vmatpush3.bf16.msra.mxu1 %v1805_v13 }
  0x6d   : > { %1697 = vmatprep.subr.bf16.mxu1 %v1806_v14 }
  0x6f   : > { %1660 = vmatmul.mubr.msk.f32.gmra.mxu0 %vm395_vm1, %v350_v53 }
  0x70   : > { %1661 = vmatprep.mubr.msk.f32.mxu0 %vm395_vm1, %v351_v54  ;;  %1698 = vmatpush3.bf16.msra.mxu1 %v1807_v15 }
  0x71   : > { %1699 = vmatprep.subr.bf16.mxu1 %v1808_v16 }
  0x73   : > { %1662 = vmatmul.mubr.msk.f32.gmra.mxu0 %vm395_vm1, %v351_v54 }
  0x74   : > { %1663 = vmatprep.mubr.msk.f32.mxu0 %vm395_vm1, %v352_v55  ;;  %1700 = vmatpush3.bf16.msra.mxu1 %v1809_v17 }
  0x77   : > { %1664 = vmatmul.mubr.msk.f32.gmra.mxu0 %vm395_vm1, %v352_v55 }
  0x78   : > { %1665 = vmatprep.mubr.msk.f32.mxu0 %vm395_vm1, %v353_v56 }
  0x7b   : > { %1666 = vmatmul.mubr.msk.f32.gmra.mxu0 %vm395_vm1, %v353_v56 }
  0x7c   : > { %1667 = vmatprep.mubr.msk.f32.mxu0 %vm395_vm1, %v354_v57 }
  0x7f   : > { %1668 = vmatmul.mubr.msk.f32.gmra.mxu0 %vm395_vm1, %v354_v57 }
  0x80   : > { %1669 = vmatprep.mubr.msk.f32.mxu0 %vm395_vm1, %v355_v58 }
  0x83   : > { %1670 = vmatmul.mubr.msk.f32.gmra.mxu0 %vm395_vm1, %v355_v58 }
  0x84   : > { %1671 = vmatprep.mubr.msk.f32.mxu0 %vm395_vm1, %v356_v59 }
  0x87   : > { %1672 = vmatmul.mubr.msk.f32.gmra.mxu0 %vm395_vm1, %v356_v59 }
  0x88   : > { %1673 = vmatprep.mubr.msk.f32.mxu0 %vm395_vm1, %v357_v60 }
  0x8b   : > { %1674 = vmatmul.mubr.msk.f32.gmra.mxu0 %vm395_vm1, %v357_v60 }
  0x8c   : > { %1675 = vmatprep.mubr.msk.f32.mxu0 %vm395_vm1, %v358_v61 }
  0x8f   : > { %1676 = vmatmul.mubr.msk.f32.gmra.mxu0 %vm395_vm1, %v358_v61 }
  0x90   : > { %1677 = vmatprep.mubr.msk.f32.mxu0 %vm395_vm1, %v359_v62 }
  0x93   : > { %1678 = vmatmul.mubr.msk.f32.gmra.mxu0 %vm395_vm1, %v359_v62 }
  0x94   : > { %1679 = vmatprep.mubr.msk.f32.mxu0 %vm395_vm1, %v360_v63 }
  0x97   : > { %1680 = vmatmul.mubr.msk.f32.gmra.mxu0 %vm395_vm1, %v360_v63 }
  0x98   : > { %1681 = vmatprep.mubr.msk.f32.mxu0 %vm395_vm1, %v361_v0 }
  0x9b   : > { %1682 = vmatmul.mubr.msk.f32.gmra.mxu0 %vm395_vm1, %v361_v0 }
  0x9c   : > { %1683 = vmatprep.mubr.msk.f32.mxu0 %vm395_vm1, %v362_v1 }
  0x9f   : > { %1684 = vmatmul.mubr.msk.f32.gmra.mxu0 %vm395_vm1, %v362_v1 }
  0xa0   : > { %v730_v36 = vpop.permute.xlu1 %729 }
  0xa3   : > { %v720_v23 = vpop.permute.xlu0 %719 }
  0xa4   : > { %v735_v50 = vpop.permute.xlu1 %734 }
  0xa7   : > { %v725_v31 = vpop.permute.xlu0 %724 }
  0xa8   : > { %v745_v8 = vpop.permute.xlu1 %744 }
  0xab   : > { %v740_v61 = vpop.permute.xlu0 %739 }
  0xaf   : > { %v750_v19 = vpop.permute.xlu0 %749 }
 0x123   : > { %v606_v25 = vpop.f32.mrf.mxu0 }
 0x124   : > { %v797_v26 = vsub.f32 %v606_v25, %v720_v23 }
 0x125   : > { %v608_v28 = vpop.f32.mrf.mxu0 }
 0x126   : > { %v841_v29 = vsub.f32 %v797_v26, %v2216_v24  ;;  %v798_v30 = vsub.f32 %v608_v28, %v720_v23 }
 0x127   : > { %v612_v32 = vpop.f32.mrf.mxu0 }
 0x128   : > { %v873_v33 = vmin.f32 %v841_v29, 0.0  ;;  %v842_v34 = vsub.f32 %v798_v30, %v2218_v27  ;;  %v799_v35 = vsub.f32 %v612_v32, %v725_v31 }
 0x129   : > { %v614_v37 = vpop.f32.mrf.mxu0 }
 0x12a   : > { %v843_v38 = vsub.f32 %v799_v35, %v2216_v24  ;;  %v800_v39 = vsub.f32 %v614_v37, %v725_v31  ;;  %v874_v40 = vmin.f32 %v842_v34, 0.0  ;;  %v905_v42 = vmul.f32 1.442695, %v873_v33 }
 0x12b   : > { %v618_v41 = vpop.f32.mrf.mxu0 }
 0x12c   : > { %v875_v43 = vmin.f32 %v843_v38, 0.0  ;;  %v844_v44 = vsub.f32 %v800_v39, %v2218_v27  ;;  %v801_v45 = vsub.f32 %v618_v41, %v730_v36  ;;  %v907_v51 = vmul.f32 1.442695, %v874_v40  ;;  %v755_v39 = vpop.permute.xlu1 %754 }
 0x12d   : > { %v620_v46 = vpop.f32.mrf.mxu0  ;;  %1810 = vpow2.f32 %v905_v42 }
 0x12e   : > { %v909_v47 = vmul.f32 1.442695, %v875_v43  ;;  %v876_v48 = vmin.f32 %v844_v44, 0.0  ;;  %v802_v49 = vsub.f32 %v620_v46, %v730_v36  ;;  %v845_v52 = vsub.f32 %v801_v45, %v2216_v24 }
 0x12f   : > { %v624_v53 = vpop.f32.mrf.mxu0 }
 0x130   : > { %v911_v54 = vmul.f32 1.442695, %v876_v48  ;;  %v846_v55 = vsub.f32 %v802_v49, %v2218_v27  ;;  %v803_v56 = vsub.f32 %v624_v53, %v735_v50  ;;  %1812 = vpow2.f32 %v909_v47  ;;  %v760_v48 = vpop.permute.xlu0 %759 }
 0x131   : > { %v877_v57 = vmin.f32 %v845_v52, 0.0  ;;  %v626_v58 = vpop.f32.mrf.mxu0 }
 0x132   : > { %1814 = vpow2.f32 %v911_v54  ;;  %v847_v59 = vsub.f32 %v803_v56, %v2216_v24  ;;  %v804_v60 = vsub.f32 %v626_v58, %v735_v50  ;;  %v878_v62 = vmin.f32 %v846_v55, 0.0 }
 0x133   : > { %1816 = vpow2.f32 %v907_v51  ;;  %v630_v63 = vpop.f32.mrf.mxu0  ;;  %v913_v0 = vmul.f32 1.442695, %v877_v57 }
 0x134   : > { %v879_v1 = vmin.f32 %v847_v59, 0.0  ;;  %v848_v2 = vsub.f32 %v804_v60, %v2218_v27  ;;  %v805_v3 = vsub.f32 %v630_v63, %v740_v61  ;;  %v915_v9 = vmul.f32 1.442695, %v878_v62  ;;  %v765_v62 = vpop.permute.xlu1 %764 }
 0x135   : > { %v632_v4 = vpop.f32.mrf.mxu0  ;;  %1818 = vpow2.f32 %v913_v0 }
 0x136   : > { %v917_v5 = vmul.f32 1.442695, %v879_v1  ;;  %v880_v6 = vmin.f32 %v848_v2, 0.0  ;;  %v849_v7 = vsub.f32 %v805_v3, %v2216_v24  ;;  %v806_v10 = vsub.f32 %v632_v4, %v740_v61 }
 0x137   : > { %v636_v11 = vpop.f32.mrf.mxu0 }
 0x138   : > { %v919_v12 = vmul.f32 1.442695, %v880_v6  ;;  %v881_v13 = vmin.f32 %v849_v7, 0.0  ;;  %v807_v14 = vsub.f32 %v636_v11, %v745_v8  ;;  %1820 = vpow2.f32 %v917_v5 }
 0x139   : > { %v850_v15 = vsub.f32 %v806_v10, %v2218_v27  ;;  %v638_v16 = vpop.f32.mrf.mxu0 }
 0x13a   : > { %1822 = vpow2.f32 %v919_v12  ;;  %v851_v17 = vsub.f32 %v807_v14, %v2216_v24  ;;  %v808_v18 = vsub.f32 %v638_v16, %v745_v8  ;;  %v921_v22 = vmul.f32 1.442695, %v881_v13  ;;  %v1811_v28 = vpop.eup %1810  ;;  %v770_v12 = vpop.permute.xlu0 %769 }
 0x13b   : > { %1824 = vpow2.f32 %v915_v9  ;;  %v882_v20 = vmin.f32 %v850_v15, 0.0  ;;  %v642_v21 = vpop.f32.mrf.mxu0 }
 0x13c   : > { %v883_v23 = vmin.f32 %v851_v17, 0.0  ;;  %v852_v25 = vsub.f32 %v808_v18, %v2218_v27  ;;  %v809_v26 = vsub.f32 %v642_v21, %v750_v19  ;;  %1826 = vpow2.f32 %v921_v22 }
 0x13d   : > { %v644_v29 = vpop.f32.mrf.mxu0  ;;  %v1813_v30 = vpop.eup %1812  ;;  %v923_v36 = vmul.f32 1.442695, %v882_v20 }
 0x13e   : > { %v925_v31 = vmul.f32 1.442695, %v883_v23  ;;  %v884_v32 = vmin.f32 %v852_v25, 0.0  ;;  %v853_v33 = vsub.f32 %v809_v26, %v2216_v24  ;;  %v810_v34 = vsub.f32 %v644_v29, %v750_v19 }
 0x13f   : > { %v1815_v35 = vpop.eup %1814  ;;  %v648_v37 = vpop.f32.mrf.mxu0  ;;  %v985_v47 = vpack.c.bf16 %v1813_v30, %v1811_v28 }
 0x140   : > { %v1817_v38 = vpop.eup %1816  ;;  %v927_v40 = vmul.f32 1.442695, %v884_v32  ;;  %v885_v41 = vmin.f32 %v853_v33, 0.0  ;;  %v854_v42 = vsub.f32 %v810_v34, %v2218_v27  ;;  %1828 = vpow2.f32 %v925_v31  ;;  %v775_v28 = vpop.permute.xlu1 %774 }
 0x141   : > { %v811_v43 = vsub.f32 %v648_v37, %v755_v39  ;;  %v650_v44 = vpop.f32.mrf.mxu0  ;;  %v986_v45 = vpack.c.bf16 %v1815_v35, %v1817_v38 }
 0x142   : > { %1830 = vpow2.f32 %v927_v40  ;;  %v812_v46 = vsub.f32 %v650_v44, %v755_v39  ;;  %v929_v49 = vmul.f32 1.442695, %v885_v41  ;;  %v886_v50 = vmin.f32 %v854_v42, 0.0  ;;  %v1819_v55 = vpop.eup %1818 }
 0x143   : > { %1832 = vpow2.f32 %v923_v36  ;;  %v855_v51 = vsub.f32 %v811_v43, %v2216_v24  ;;  %1161 = vmatprep.mubr.bf16.mxu1 %v986_v45  ;;  %v654_v52 = vpop.f32.mrf.mxu0 }
 0x144   : > { %v856_v53 = vsub.f32 %v812_v46, %v2218_v27  ;;  %v813_v54 = vsub.f32 %v654_v52, %v760_v48  ;;  %1162 = vmatmul.mubr.bf16.vlgmr.msra.gmra.mxu1 %v985_v47  ;;  %1834 = vpow2.f32 %v929_v49  ;;  %v931_v63 = vmul.f32 1.442695, %v886_v50  ;;  %v780_v46 = vpop.permute.xlu0 %779 }
 0x145   : > { %v887_v56 = vmin.f32 %v855_v51, 0.0  ;;  %v656_v57 = vpop.f32.mrf.mxu0  ;;  %v1821_v58 = vpop.eup %1820 }
 0x146   : > { %v888_v59 = vmin.f32 %v856_v53, 0.0  ;;  %v814_v60 = vsub.f32 %v656_v57, %v760_v48  ;;  %v857_v4 = vsub.f32 %v813_v54, %v2216_v24  ;;  %v987_v11 = vpack.c.bf16 %v1821_v58, %v1819_v55  ;;  %v785_v57 = vpop.permute.xlu1 %784 }
 0x147   : > { %v1823_v61 = vpop.eup %1822  ;;  %v933_v0 = vmul.f32 1.442695, %v887_v56  ;;  %v660_v1 = vpop.f32.mrf.mxu0 }
 0x148   : > { %v1825_v2 = vpop.eup %1824  ;;  %v935_v3 = vmul.f32 1.442695, %v888_v59  ;;  %v858_v5 = vsub.f32 %v814_v60, %v2218_v27  ;;  %v815_v6 = vsub.f32 %v660_v1, %v765_v62  ;;  %v889_v15 = vmin.f32 %v857_v4, 0.0 }
 0x149   : > { %1836 = vpow2.f32 %v933_v0  ;;  %v662_v7 = vpop.f32.mrf.mxu0  ;;  %v988_v8 = vpack.c.bf16 %v1823_v61, %v1825_v2  ;;  %v1827_v18 = vpop.eup %1826 }
 0x14a   : > { %1838 = vpow2.f32 %v935_v3  ;;  %v890_v9 = vmin.f32 %v858_v5, 0.0  ;;  %v859_v10 = vsub.f32 %v815_v6, %v2216_v24  ;;  %v816_v13 = vsub.f32 %v662_v7, %v765_v62  ;;  %v790_v7 = vpop.permute.xlu0 %789 }
 0x14b   : > { %1840 = vpow2.f32 %v931_v63  ;;  %1169 = vmatprep.mubr.bf16.mxu1 %v988_v8  ;;  %v666_v14 = vpop.f32.mrf.mxu0  ;;  %v937_v33 = vmul.f32 1.442695, %v889_v15 }
 0x14c   : > { %v891_v16 = vmin.f32 %v859_v10, 0.0  ;;  %v817_v17 = vsub.f32 %v666_v14, %v770_v12  ;;  %1170 = vmatmul.mubr.bf16.gmra.mxu1 %v987_v11  ;;  %v939_v19 = vmul.f32 1.442695, %v890_v9  ;;  %v860_v20 = vsub.f32 %v816_v13, %v2218_v27 }
 0x14d   : > { %v668_v21 = vpop.f32.mrf.mxu0  ;;  %v1829_v22 = vpop.eup %1828 }
 0x14e   : > { %v941_v23 = vmul.f32 1.442695, %v891_v16  ;;  %v818_v25 = vsub.f32 %v668_v21, %v770_v12  ;;  %v892_v29 = vmin.f32 %v860_v20, 0.0  ;;  %v861_v30 = vsub.f32 %v817_v17, %v2216_v24 }
 0x14f   : > { %v1831_v26 = vpop.eup %1830  ;;  %v672_v31 = vpop.f32.mrf.mxu0  ;;  %1842 = vpow2.f32 %v939_v19  ;;  %v989_v39 = vpack.c.bf16 %v1829_v22, %v1827_v18 }
 0x150   : > { %v1833_v32 = vpop.eup %1832  ;;  %v862_v34 = vsub.f32 %v818_v25, %v2218_v27  ;;  %v819_v35 = vsub.f32 %v672_v31, %v775_v28  ;;  %v943_v36 = vmul.f32 1.442695, %v892_v29  ;;  %1844 = vpow2.f32 %v941_v23  ;;  %v795_v19 = vpop.permute.xlu1 %794 }
 0x151   : > { %v674_v37 = vpop.f32.mrf.mxu0  ;;  %v990_v38 = vpack.c.bf16 %v1831_v26, %v1833_v32  ;;  %v893_v43 = vmin.f32 %v861_v30, 0.0  ;;  %v1835_v45 = vpop.eup %1834 }
 0x152   : > { %v894_v40 = vmin.f32 %v862_v34, 0.0  ;;  %v863_v41 = vsub.f32 %v819_v35, %v2216_v24  ;;  %v820_v42 = vsub.f32 %v674_v37, %v775_v28  ;;  %1846 = vpow2.f32 %v943_v36 }
 0x153   : > { %1177 = vmatprep.mubr.bf16.mxu1 %v990_v38  ;;  %v678_v44 = vpop.f32.mrf.mxu0  ;;  %1848 = vpow2.f32 %v937_v33  ;;  %v945_v58 = vmul.f32 1.442695, %v893_v43 }
 0x154   : > { %v947_v47 = vmul.f32 1.442695, %v894_v40  ;;  %v895_v48 = vmin.f32 %v863_v41, 0.0  ;;  %v864_v49 = vsub.f32 %v820_v42, %v2218_v27  ;;  %1178 = vmatmul.mubr.bf16.gmra.mxu1 %v989_v39  ;;  %v821_v50 = vsub.f32 %v678_v44, %v780_v46 }
 0x155   : > { %v680_v51 = vpop.f32.mrf.mxu0 }
 0x156   : > { %v1837_v52 = vpop.eup %1836  ;;  %v949_v53 = vmul.f32 1.442695, %v895_v48  ;;  %v896_v54 = vmin.f32 %v864_v49, 0.0  ;;  %v822_v55 = vsub.f32 %v680_v51, %v780_v46  ;;  %v865_v59 = vsub.f32 %v821_v50, %v2216_v24 }
 0x157   : > { %v1839_v56 = vpop.eup %1838  ;;  %v684_v60 = vpop.f32.mrf.mxu0  ;;  %1850 = vpow2.f32 %v947_v47  ;;  %v991_v3 = vpack.c.bf16 %v1837_v52, %v1835_v45 }
 0x158   : > { %v1841_v61 = vpop.eup %1840  ;;  %v951_v62 = vmul.f32 1.442695, %v896_v54  ;;  %v866_v63 = vsub.f32 %v822_v55, %v2218_v27  ;;  %v823_v0 = vsub.f32 %v684_v60, %v785_v57  ;;  %1852 = vpow2.f32 %v949_v53 }
 0x159   : > { %v686_v1 = vpop.f32.mrf.mxu0  ;;  %v992_v2 = vpack.c.bf16 %v1839_v56, %v1841_v61  ;;  %v897_v8 = vmin.f32 %v865_v59, 0.0 }
 0x15a   : > { %1854 = vpow2.f32 %v951_v62  ;;  %v898_v4 = vmin.f32 %v866_v63, 0.0  ;;  %v867_v5 = vsub.f32 %v823_v0, %v2216_v24  ;;  %v824_v6 = vsub.f32 %v686_v1, %v785_v57  ;;  %v969_v62 = vld [vmem:[#allocation2] sm:$0xff] }
 0x15b   : > { %1856 = vpow2.f32 %v945_v58  ;;  %1185 = vmatprep.mubr.bf16.mxu1 %v992_v2  ;;  %v690_v9 = vpop.f32.mrf.mxu0  ;;  %v953_v20 = vmul.f32 1.442695, %v897_v8  ;;  %v971_v8 = vld [vmem:[#allocation2 + $0x10] sm:$0xff] }
 0x15c   : > { %v955_v10 = vmul.f32 1.442695, %v898_v4  ;;  %v899_v11 = vmin.f32 %v867_v5, 0.0  ;;  %v868_v12 = vsub.f32 %v824_v6, %v2218_v27  ;;  %v825_v13 = vsub.f32 %v690_v9, %v790_v7  ;;  %1186 = vmatmul.mubr.bf16.gmra.mxu1 %v991_v3  ;;  %v1843_v15 = vpop.eup %1842  ;;  %v970_v3 = vld [vmem:[#allocation2 + $0x8] sm:$0xff] }
 0x15d   : > { %v692_v14 = vpop.f32.mrf.mxu0  ;;  %v1845_v18 = vpop.eup %1844 }
 0x15e   : > { %v957_v16 = vmul.f32 1.442695, %v899_v11  ;;  %v900_v17 = vmin.f32 %v868_v12, 0.0  ;;  %v826_v21 = vsub.f32 %v692_v14, %v790_v7  ;;  %1858 = vpow2.f32 %v955_v10 }
 0x15f   : > { %v696_v22 = vpop.f32.mrf.mxu0  ;;  %v1847_v23 = vpop.eup %1846  ;;  %v869_v26 = vsub.f32 %v825_v13, %v2216_v24  ;;  %v972_v13 = vld [vmem:[#allocation2 + $0x18] sm:$0xff] }
 0x160   : > { %v959_v25 = vmul.f32 1.442695, %v900_v17  ;;  %v827_v28 = vsub.f32 %v696_v22, %v795_v19  ;;  %v1849_v29 = vpop.eup %1848  ;;  %1860 = vpow2.f32 %v957_v16  ;;  %v870_v30 = vsub.f32 %v826_v21, %v2218_v27 }
 0x161   : > { %v698_v31 = vpop.f32.mrf.mxu0  ;;  %v994_v32 = vpack.c.bf16 %v1847_v23, %v1843_v15  ;;  %v993_v35 = vpack.c.bf16 %v1845_v18, %v1849_v29  ;;  %v901_v37 = vmin.f32 %v869_v26, 0.0  ;;  %v973_v18 = vld [vmem:[#allocation2 + $0x20] sm:$0xff]  ;;  %v974_v23 = vld [vmem:[#allocation2 + $0x28] sm:$0xff] }
 0x162   : > { %1862 = vpow2.f32 %v959_v25  ;;  %v871_v33 = vsub.f32 %v827_v28, %v2216_v24  ;;  %v828_v34 = vsub.f32 %v698_v31, %v795_v19  ;;  %v902_v36 = vmin.f32 %v870_v30, 0.0  ;;  %v975_v30 = vld [vmem:[#allocation2 + $0x30] sm:$0xff] }
 0x163   : > { %1193 = vmatprep.mubr.bf16.mxu1 %v994_v32  ;;  %1864 = vpow2.f32 %v953_v20  ;;  %v961_v47 = vmul.f32 1.442695, %v901_v37 }
 0x164   : > { %v903_v38 = vmin.f32 %v871_v33, 0.0  ;;  %v872_v39 = vsub.f32 %v828_v34, %v2218_v27  ;;  %1194 = vmatmul.mubr.bf16.gmra.mxu1 %v993_v35  ;;  %v1851_v40 = vpop.eup %1850  ;;  %v963_v41 = vmul.f32 1.442695, %v902_v36  ;;  %v976_v35 = vld [vmem:[#allocation2 + $0x38] sm:$0xff] }
 0x165   : > { %v1853_v42 = vpop.eup %1852 }
 0x166   : > { %v965_v43 = vmul.f32 1.442695, %v903_v38  ;;  %v904_v44 = vmin.f32 %v872_v39, 0.0  ;;  %1866 = vpow2.f32 %v963_v41 }
 0x167   : > { %v1855_v45 = vpop.eup %1854 }
 0x168   : > { %v1857_v46 = vpop.eup %1856  ;;  %v967_v24 = vmul.f32 1.442695, %v904_v44  ;;  %v996_v48 = vpack.c.bf16 %v1855_v45, %v1851_v40  ;;  %1868 = vpow2.f32 %v965_v43  ;;  %v977_v40 = vld [vmem:[#allocation2 + $0x40] sm:$0xff]  ;;  %v978_v45 = vld [vmem:[#allocation2 + $0x48] sm:$0xff] }
 0x169   : > { %v995_v49 = vpack.c.bf16 %v1853_v42, %v1857_v46 }
 0x16a   : > { %1870 = vpow2.f32 %v967_v24  ;;  %1201 = vmatprep.mubr.bf16.mxu1 %v996_v48 }
 0x16b   : > { %1872 = vpow2.f32 %v961_v47  ;;  %v1859_v50 = vpop.eup %1858 }
 0x16c   : > { %1202 = vmatmul.mubr.bf16.gmra.mxu1 %v995_v49  ;;  %v979_v49 = vld [vmem:[#allocation2 + $0x50] sm:$0xff] }
 0x16d   : > { %v1861_v27 = vpop.eup %1860 }
 0x16f   : > { %v1863_v51 = vpop.eup %1862 }
 0x170   : > { %v998_v52 = vpack.c.bf16 %v1863_v51, %v1859_v50  ;;  %v1865_v53 = vpop.eup %1864 }
 0x171   : > { %v997_v54 = vpack.c.bf16 %v1861_v27, %v1865_v53  ;;  %v980_v53 = vld [vmem:[#allocation2 + $0x58] sm:$0xff] }
 0x172   : > { %1209 = vmatprep.mubr.bf16.mxu1 %v998_v52 }
 0x173   : > { %v1867_v55 = vpop.eup %1866 }
 0x174   : > { %1210 = vmatmul.mubr.bf16.gmra.mxu1 %v997_v54 }
 0x175   : > { %v1869_v56 = vpop.eup %1868 }
 0x177   : > { %v1871_v57 = vpop.eup %1870 }
 0x178   : > { %v1000_v58 = vpack.c.bf16 %v1871_v57, %v1867_v55  ;;  %v1873_v59 = vpop.eup %1872 }
 0x179   : > { %v999_v60 = vpack.c.bf16 %v1869_v56, %v1873_v59 }
 0x17a   : > { %1217 = vmatprep.mubr.bf16.mxu1 %v1000_v58  ;;  %v981_v58 = vld [vmem:[#allocation2 + $0x60] sm:$0xff] }
 0x17c   : > { %1218 = vmatmul.mubr.bf16.gmra.mxu1 %v999_v60 }
 0x204   : > { %v1701_v61 = vpop.f32.mrf.mxu1 }
 0x206   : > { %v1702_v63 = vpop.f32.mrf.mxu1 }
 0x207   : > { %v1703_v0 = vadd.f32 %v1702_v63, %v1701_v61  ;;  %v982_v63 = vld [vmem:[#allocation2 + $0x68] sm:$0xff] }
 0x208   : > { %v1704_v1 = vpop.f32.mrf.mxu1 }
 0x209   : > { %v1226_v2 = vadd.f32 %v1703_v0, %v969_v62 }
 0x20a   : > { %v1705_v4 = vpop.f32.mrf.mxu1 }
 0x20b   : > { %1243 = vst.msk [vmem:[#allocation2] sm:$0xff] %vm1242_vm2, %v1226_v2  ;;  %v1706_v5 = vadd.f32 %v1705_v4, %v1704_v1  ;;  %v983_v4 = vld [vmem:[#allocation2 + $0x70] sm:$0xff] }
 0x20c   : > { %v1707_v6 = vpop.f32.mrf.mxu1 }
 0x20d   : > { %v1227_v7 = vadd.f32 %v1706_v5, %v970_v3 }
 0x20e   : > { %v1708_v9 = vpop.f32.mrf.mxu1 }
 0x20f   : > { %1244 = vst.msk [vmem:[#allocation2 + $0x8] sm:$0xff] %vm1242_vm2, %v1227_v7  ;;  %v1709_v10 = vadd.f32 %v1708_v9, %v1707_v6  ;;  %v984_v9 = vld [vmem:[#allocation2 + $0x78] sm:$0xff] }
 0x210   : > { %v1710_v11 = vpop.f32.mrf.mxu1 }
 0x211   : > { %v1228_v12 = vadd.f32 %v1709_v10, %v971_v8 }
 0x212   : > { %v1711_v14 = vpop.f32.mrf.mxu1 }
 0x213   : > { %1245 = vst.msk [vmem:[#allocation2 + $0x10] sm:$0xff] %vm1242_vm2, %v1228_v12  ;;  %v1712_v15 = vadd.f32 %v1711_v14, %v1710_v11 }
 0x214   : > { %v1713_v16 = vpop.f32.mrf.mxu1 }
 0x215   : > { %v1229_v17 = vadd.f32 %v1712_v15, %v972_v13 }
 0x216   : > { %v1714_v19 = vpop.f32.mrf.mxu1 }
 0x217   : > { %1246 = vst.msk [vmem:[#allocation2 + $0x18] sm:$0xff] %vm1242_vm2, %v1229_v17  ;;  %v1715_v20 = vadd.f32 %v1714_v19, %v1713_v16 }
 0x218   : > { %v1716_v21 = vpop.f32.mrf.mxu1 }
 0x219   : > { %v1230_v22 = vadd.f32 %v1715_v20, %v973_v18 }
 0x21a   : > { %v1717_v25 = vpop.f32.mrf.mxu1 }
 0x21b   : > { %1247 = vst.msk [vmem:[#allocation2 + $0x20] sm:$0xff] %vm1242_vm2, %v1230_v22  ;;  %v1718_v26 = vadd.f32 %v1717_v25, %v1716_v21 }
 0x21c   : > { %v1719_v28 = vpop.f32.mrf.mxu1 }
 0x21d   : > { %v1231_v29 = vadd.f32 %v1718_v26, %v974_v23 }
 0x21e   : > { %v1720_v31 = vpop.f32.mrf.mxu1 }
 0x21f   : > { %1248 = vst.msk [vmem:[#allocation2 + $0x28] sm:$0xff] %vm1242_vm2, %v1231_v29  ;;  %v1721_v32 = vadd.f32 %v1720_v31, %v1719_v28 }
 0x220   : > { %v1722_v33 = vpop.f32.mrf.mxu1 }
 0x221   : > { %v1232_v34 = vadd.f32 %v1721_v32, %v975_v30 }
 0x222   : > { %v1723_v36 = vpop.f32.mrf.mxu1 }
 0x223   : > { %1249 = vst.msk [vmem:[#allocation2 + $0x30] sm:$0xff] %vm1242_vm2, %v1232_v34  ;;  %v1724_v37 = vadd.f32 %v1723_v36, %v1722_v33 }
 0x224   : > { %v1725_v38 = vpop.f32.mrf.mxu1 }
 0x225   : > { %v1233_v39 = vadd.f32 %v1724_v37, %v976_v35 }
 0x226   : > { %v1726_v41 = vpop.f32.mrf.mxu1 }
 0x227   : > { %1250 = vst.msk [vmem:[#allocation2 + $0x38] sm:$0xff] %vm1242_vm2, %v1233_v39  ;;  %v1727_v42 = vadd.f32 %v1726_v41, %v1725_v38 }
 0x228   : > { %v1728_v43 = vpop.f32.mrf.mxu1 }
 0x229   : > { %v1234_v44 = vadd.f32 %v1727_v42, %v977_v40 }
 0x22a   : > { %v1729_v46 = vpop.f32.mrf.mxu1 }
 0x22b   : > { %1251 = vst.msk [vmem:[#allocation2 + $0x40] sm:$0xff] %vm1242_vm2, %v1234_v44  ;;  %v1730_v47 = vadd.f32 %v1729_v46, %v1728_v43 }
 0x22c   : > { %v1731_v24 = vpop.f32.mrf.mxu1 }
 0x22d   : > { %v1235_v48 = vadd.f32 %v1730_v47, %v978_v45 }
 0x22e   : > { %v1732_v50 = vpop.f32.mrf.mxu1 }
 0x22f   : > { %1252 = vst.msk [vmem:[#allocation2 + $0x48] sm:$0xff] %vm1242_vm2, %v1235_v48  ;;  %v1733_v27 = vadd.f32 %v1732_v50, %v1731_v24 }
 0x230   : > { %v1734_v51 = vpop.f32.mrf.mxu1 }
 0x231   : > { %v1236_v52 = vadd.f32 %v1733_v27, %v979_v49 }
 0x232   : > { %v1735_v54 = vpop.f32.mrf.mxu1 }
 0x233   : > { %1253 = vst.msk [vmem:[#allocation2 + $0x50] sm:$0xff] %vm1242_vm2, %v1236_v52  ;;  %v1736_v55 = vadd.f32 %v1735_v54, %v1734_v51 }
 0x234   : > { %v1737_v56 = vpop.f32.mrf.mxu1 }
 0x235   : > { %v1237_v57 = vadd.f32 %v1736_v55, %v980_v53 }
 0x236   : > { %v1738_v59 = vpop.f32.mrf.mxu1 }
 0x237   : > { %1254 = vst.msk [vmem:[#allocation2 + $0x58] sm:$0xff] %vm1242_vm2, %v1237_v57  ;;  %v1739_v60 = vadd.f32 %v1738_v59, %v1737_v56 }
 0x238   : > { %v1740_v61 = vpop.f32.mrf.mxu1 }
 0x239   : > { %v1238_v62 = vadd.f32 %v1739_v60, %v981_v58 }
 0x23a   : > { %v1741_v0 = vpop.f32.mrf.mxu1 }
 0x23b   : > { %1255 = vst.msk [vmem:[#allocation2 + $0x60] sm:$0xff] %vm1242_vm2, %v1238_v62  ;;  %v1742_v1 = vadd.f32 %v1741_v0, %v1740_v61 }
 0x23c   : > { %v1743_v2 = vpop.f32.mrf.mxu1 }
 0x23d   : > { %v1239_v3 = vadd.f32 %v1742_v1, %v982_v63 }
 0x23e   : > { %v1744_v5 = vpop.f32.mrf.mxu1 }
 0x23f   : > { %1256 = vst.msk [vmem:[#allocation2 + $0x68] sm:$0xff] %vm1242_vm2, %v1239_v3  ;;  %v1745_v6 = vadd.f32 %v1744_v5, %v1743_v2 }
 0x240   : > { %v1746_v7 = vpop.f32.mrf.mxu1 }
 0x241   : > { %v1240_v8 = vadd.f32 %v1745_v6, %v983_v4 }
 0x242   : > { %v1747_v10 = vpop.f32.mrf.mxu1 }
 0x243   : > { %1257 = vst.msk [vmem:[#allocation2 + $0x70] sm:$0xff] %vm1242_vm2, %v1240_v8  ;;  %v1748_v11 = vadd.f32 %v1747_v10, %v1746_v7  ;;  %1262 = sbr.rel (%p1618_p9) target bundleno = 757 (0x2f5), region = 48 }
 0x245   : > { %v1241_v12 = vadd.f32 %v1748_v11, %v984_v9 }
 0x247   : > { %1258 = vst.msk [vmem:[#allocation2 + $0x78] sm:$0xff] %vm1242_vm2, %v1241_v12 }
 0x248   : > { %v2269_v13 = vld [vmem:[#allocation2 + $0x10] sm:$0xff]  ;;  %v2271_v14 = vld [vmem:[#allocation2] sm:$0xff]  ;;  %v2273_v15 = vld [vmem:[#allocation2 + $0x18] sm:$0xff]  ;;  %v1950_v16 = vmov 8   ;;  %vm1407_vm3 = vcmask 64512  }
 0x249   : > { %1875 = vset.pattern.permute.xlu1 %v1950_v16  ;;  %1874 = vset.pattern.permute.xlu0 %v1950_v16  ;;  %v1281_v17 = vadd.f32 1e-08, %v2269_v13  ;;  %v1279_v18 = vadd.f32 1e-08, %v2271_v14  ;;  %v2277_v19 = vld [vmem:[#allocation2 + $0x8] sm:$0xff]  ;;  %v2283_v23 = vld [vmem:[#allocation2 + $0x20] sm:$0xff] }
 0x24a   : > { %v1282_v20 = vadd.f32 1e-08, %v2273_v15  ;;  %v1280_v21 = vadd.f32 1e-08, %v2277_v19  ;;  %v2281_v22 = vld [vmem:[#allocation2 + $0x28] sm:$0xff]  ;;  %v2287_v28 = vld [vmem:[#allocation2 + $0x38] sm:$0xff] }
 0x24b   : > { %1307 = vperm.xlu1 %1875, %v1281_v17   ;;  %1297 = vperm.xlu0 %1874, %v1279_v18   ;;  %v1284_v25 = vadd.f32 1e-08, %v2281_v22  ;;  %v1283_v26 = vadd.f32 1e-08, %v2283_v23  ;;  %v2289_v29 = vld [vmem:[#allocation2 + $0x30] sm:$0xff]  ;;  %v2293_v32 = vld [vmem:[#allocation2 + $0x48] sm:$0xff] }
 0x24c   : > { %v1286_v30 = vadd.f32 1e-08, %v2287_v28  ;;  %v1285_v31 = vadd.f32 1e-08, %v2289_v29  ;;  %v2295_v33 = vld [vmem:[#allocation2 + $0x40] sm:$0xff]  ;;  %v2299_v36 = vld [vmem:[#allocation2 + $0x58] sm:$0xff] }
 0x24d   : > { %v1288_v34 = vadd.f32 1e-08, %v2293_v32  ;;  %v1287_v35 = vadd.f32 1e-08, %v2295_v33  ;;  %v2301_v37 = vld [vmem:[#allocation2 + $0x50] sm:$0xff]  ;;  %v2305_v40 = vld [vmem:[#allocation2 + $0x68] sm:$0xff] }
 0x24e   : > { %v1290_v38 = vadd.f32 1e-08, %v2299_v36  ;;  %v1289_v39 = vadd.f32 1e-08, %v2301_v37  ;;  %v2307_v41 = vld [vmem:[#allocation2 + $0x60] sm:$0xff]  ;;  %v2311_v44 = vld [vmem:[#allocation2 + $0x78] sm:$0xff] }
 0x24f   : > { %1312 = vperm.xlu1 %1875, %v1282_v20   ;;  %1302 = vperm.xlu0 %1874, %v1280_v21   ;;  %v1292_v42 = vadd.f32 1e-08, %v2305_v40  ;;  %v1291_v43 = vadd.f32 1e-08, %v2307_v41  ;;  %v2313_v45 = vld [vmem:[#allocation2 + $0x70] sm:$0xff] }
 0x250   : > { %v1294_v46 = vadd.f32 1e-08, %v2311_v44  ;;  %v1293_v47 = vadd.f32 1e-08, %v2313_v45 }
 0x253   : > { %1322 = vperm.xlu1 %1875, %v1284_v25   ;;  %1317 = vperm.xlu0 %1874, %v1283_v26  }
 0x257   : > { %1332 = vperm.xlu1 %1875, %v1286_v30   ;;  %1327 = vperm.xlu0 %1874, %v1285_v31  }
 0x25b   : > { %1342 = vperm.xlu1 %1875, %v1288_v34   ;;  %1337 = vperm.xlu0 %1874, %v1287_v35  }
 0x25f   : > { %1352 = vperm.xlu1 %1875, %v1290_v38   ;;  %1347 = vperm.xlu0 %1874, %v1289_v39  }
 0x263   : > { %1362 = vperm.xlu1 %1875, %v1292_v42   ;;  %1357 = vperm.xlu0 %1874, %v1291_v43  }
 0x267   : > { %1372 = vperm.xlu1 %1875, %v1294_v46   ;;  %1367 = vperm.xlu0 %1874, %v1293_v47  }
 0x2c6   : > { %v1308_v24 = vpop.permute.xlu1 %1307  ;;  %v1298_v48 = vpop.permute.xlu0 %1297 }
 0x2c7   : > { %1876 = vrcp.f32 %v1308_v24 }
 0x2c8   : > { %1878 = vrcp.f32 %v1298_v48 }
 0x2ca   : > { %v1313_v49 = vpop.permute.xlu1 %1312  ;;  %v1303_v50 = vpop.permute.xlu0 %1302 }
 0x2cb   : > { %1880 = vrcp.f32 %v1313_v49 }
 0x2cc   : > { %1882 = vrcp.f32 %v1303_v50 }
 0x2ce   : > { %v1323_v27 = vpop.permute.xlu1 %1322  ;;  %v1318_v51 = vpop.permute.xlu0 %1317 }
 0x2cf   : > { %1884 = vrcp.f32 %v1323_v27 }
 0x2d0   : > { %1886 = vrcp.f32 %v1318_v51 }
 0x2d2   : > { %v1333_v52 = vpop.permute.xlu1 %1332  ;;  %v1328_v53 = vpop.permute.xlu0 %1327 }
 0x2d3   : > { %1888 = vrcp.f32 %v1333_v52 }
 0x2d4   : > { %v1877_v54 = vpop.eup %1876  ;;  %1890 = vrcp.f32 %v1328_v53 }
 0x2d5   : > { %v1879_v55 = vpop.eup %1878  ;;  %v1380_v56 = vmul.f32 %v1877_v54, %v2269_v13 }
 0x2d6   : > { %v1376_v57 = vmul.f32 %v1879_v55, %v2271_v14  ;;  %v1343_v58 = vpop.permute.xlu1 %1342  ;;  %v1338_v59 = vpop.permute.xlu0 %1337 }
 0x2d7   : > { %1410 = vst.msk [vmem:[%s2040_s29 + $0x10] sm:$0xff] %vm1407_vm3, %v1380_v56  ;;  %1892 = vrcp.f32 %v1343_v58 }
 0x2d8   : > { %v1881_v60 = vpop.eup %1880  ;;  %1408 = vst.msk [vmem:[%s2040_s29] sm:$0xff] %vm1407_vm3, %v1376_v57  ;;  %1894 = vrcp.f32 %v1338_v59 }
 0x2d9   : > { %v1883_v61 = vpop.eup %1882  ;;  %v1382_v62 = vmul.f32 %v1881_v60, %v2273_v15 }
 0x2da   : > { %v1378_v63 = vmul.f32 %v1883_v61, %v2277_v19  ;;  %v1353_v0 = vpop.permute.xlu1 %1352  ;;  %v1348_v1 = vpop.permute.xlu0 %1347 }
 0x2db   : > { %1411 = vst.msk [vmem:[%s2040_s29 + $0x18] sm:$0xff] %vm1407_vm3, %v1382_v62  ;;  %1896 = vrcp.f32 %v1353_v0 }
 0x2dc   : > { %v1885_v2 = vpop.eup %1884  ;;  %1409 = vst.msk [vmem:[%s2040_s29 + $0x8] sm:$0xff] %vm1407_vm3, %v1378_v63  ;;  %1898 = vrcp.f32 %v1348_v1 }
 0x2dd   : > { %v1887_v3 = vpop.eup %1886  ;;  %v1386_v4 = vmul.f32 %v1885_v2, %v2281_v22 }
 0x2de   : > { %v1384_v5 = vmul.f32 %v1887_v3, %v2283_v23  ;;  %v1363_v6 = vpop.permute.xlu1 %1362  ;;  %v1358_v7 = vpop.permute.xlu0 %1357 }
 0x2df   : > { %1413 = vst.msk [vmem:[%s2040_s29 + $0x28] sm:$0xff] %vm1407_vm3, %v1386_v4  ;;  %1900 = vrcp.f32 %v1363_v6 }
 0x2e0   : > { %v1889_v8 = vpop.eup %1888  ;;  %1412 = vst.msk [vmem:[%s2040_s29 + $0x20] sm:$0xff] %vm1407_vm3, %v1384_v5  ;;  %1902 = vrcp.f32 %v1358_v7 }
 0x2e1   : > { %v1891_v9 = vpop.eup %1890  ;;  %v1390_v10 = vmul.f32 %v1889_v8, %v2287_v28 }
 0x2e2   : > { %v1388_v11 = vmul.f32 %v1891_v9, %v2289_v29  ;;  %v1373_v12 = vpop.permute.xlu1 %1372  ;;  %v1368_v13 = vpop.permute.xlu0 %1367 }
 0x2e3   : > { %1415 = vst.msk [vmem:[%s2040_s29 + $0x38] sm:$0xff] %vm1407_vm3, %v1390_v10  ;;  %1904 = vrcp.f32 %v1373_v12 }
 0x2e4   : > { %v1893_v14 = vpop.eup %1892  ;;  %1414 = vst.msk [vmem:[%s2040_s29 + $0x30] sm:$0xff] %vm1407_vm3, %v1388_v11  ;;  %1906 = vrcp.f32 %v1368_v13 }
 0x2e5   : > { %v1895_v15 = vpop.eup %1894  ;;  %v1394_v16 = vmul.f32 %v1893_v14, %v2293_v32 }
 0x2e6   : > { %v1392_v17 = vmul.f32 %v1895_v15, %v2295_v33 }
 0x2e7   : > { %1417 = vst.msk [vmem:[%s2040_s29 + $0x48] sm:$0xff] %vm1407_vm3, %v1394_v16 }
 0x2e8   : > { %v1897_v18 = vpop.eup %1896  ;;  %1416 = vst.msk [vmem:[%s2040_s29 + $0x40] sm:$0xff] %vm1407_vm3, %v1392_v17 }
 0x2e9   : > { %v1899_v19 = vpop.eup %1898  ;;  %v1398_v20 = vmul.f32 %v1897_v18, %v2299_v36 }
 0x2ea   : > { %v1396_v21 = vmul.f32 %v1899_v19, %v2301_v37 }
 0x2eb   : > { %1419 = vst.msk [vmem:[%s2040_s29 + $0x58] sm:$0xff] %vm1407_vm3, %v1398_v20 }
 0x2ec   : > { %v1901_v22 = vpop.eup %1900  ;;  %1418 = vst.msk [vmem:[%s2040_s29 + $0x50] sm:$0xff] %vm1407_vm3, %v1396_v21 }
 0x2ed   : > { %v1903_v23 = vpop.eup %1902  ;;  %v1402_v25 = vmul.f32 %v1901_v22, %v2305_v40 }
 0x2ee   : > { %v1400_v26 = vmul.f32 %v1903_v23, %v2307_v41 }
 0x2ef   : > { %1421 = vst.msk [vmem:[%s2040_s29 + $0x68] sm:$0xff] %vm1407_vm3, %v1402_v25 }
 0x2f0   : > { %v1905_v28 = vpop.eup %1904  ;;  %1420 = vst.msk [vmem:[%s2040_s29 + $0x60] sm:$0xff] %vm1407_vm3, %v1400_v26 }
 0x2f1   : > { %v1907_v29 = vpop.eup %1906  ;;  %v1406_v30 = vmul.f32 %v1905_v28, %v2311_v44 }
 0x2f2   : > { %v1404_v31 = vmul.f32 %v1907_v29, %v2313_v45 }
 0x2f3   : > { %1423 = vst.msk [vmem:[%s2040_s29 + $0x78] sm:$0xff] %vm1407_vm3, %v1406_v30 }
 0x2f4   : > { %1422 = vst.msk [vmem:[%s2040_s29 + $0x70] sm:$0xff] %vm1407_vm3, %v1404_v31 }
 0x2f5 PF: > { %s15_s22 = sadd.s32 1, %s1946_s22   ;;  %s2386_s18 = smov %s1938_s20 }
 0x2f6   : > { %p12_p10 = scmp.ge.s32.totalorder %s15_s22, 6   ;;  %s2387_s19 = smov %s1942_s21 }
 0x2f7   : > { %s2388_s20 = smov %s2391_s23  ;;  %s2389_s21 = smov %s2395_s24 }
 0x2f8   :  { %14 = sbr.rel (!%p12_p10) target bundleno = 3 (0x3), region = 90 }

</bundles_post_ra>
